<compile_context>
chip_gen: v7x
topology: tpu7x:2x2x1
jax: 0.10.0
libtpu: 0.0.40
codegen_flags: <defaults>
</compile_context>

<pallas_src>
import jax
import jax.numpy as jnp
from jax.experimental import pallas as pl
from jax.experimental.pallas import tpu as pltpu

_PREC = jax.lax.Precision.HIGHEST


def _round_up(x, m):
    return ((x + m - 1) // m) * m


# ---------------------------------------------------------------------------
# Kernel body: packed block-diagonal two-layer MLP for both heads.
# ---------------------------------------------------------------------------
def _packed_heads_kernel(x_ref, xa_ref, w1h_ref, w1a_ref, b1_ref, w2_ref,
                         b2_ref, o_ref, oa_ref):
    """o = relu(x@hw1+hb1)@hw2+hb2 ; oa = relu(xa@aw1+ab1)@aw2+ab2 (packed).

    Hidden lanes [0:D] belong to `head`, [D:D+Da] to `head_art`, the rest are
    zero padding (zero bias, zero W2 rows -> exact no-op).  Output lanes
    [0:F] = head, [F:2F] = head_art.  All accumulation in f32.
    """
    h = jnp.dot(x_ref[...], w1h_ref[...],
                preferred_element_type=jnp.float32, precision=_PREC)
    h = h + jnp.dot(xa_ref[...], w1a_ref[...],
                    preferred_element_type=jnp.float32, precision=_PREC)
    h = jnp.maximum(h + b1_ref[...], 0.0)           # ReLU on the VPU, full-lane
    y = jnp.dot(h, w2_ref[...],
                preferred_element_type=jnp.float32, precision=_PREC)
    y = y + b2_ref[...]
    f = o_ref.shape[-1]
    o_ref[...] = y[:, :f].astype(o_ref.dtype)        # lane-aligned static slices
    oa_ref[...] = y[:, f:].astype(oa_ref.dtype)


def _choose_batch_tile(batch, max_tile):
    """Pick tb (multiple of 8) giving an EVEN grid step count (v7x megacore)."""
    n_steps = pl.cdiv(batch, max_tile)
    if n_steps % 2:
        n_steps += 1
    return _round_up(pl.cdiv(batch, n_steps), 8)


def fused_projection_heads(x, xa, w1h, w1a, b1, w2, b2, feat_dim,
                           *, max_batch_tile=2048, jnp_fallback_batch=0):
    """Run both projection heads in a single pallas_call.

    x: (B, D), xa: (B, Da); packed weights:
      w1h: (D, Hp)   w1a: (Da, Hp)   b1: (1, Hp)   w2: (Hp, 2F)   b2: (1, 2F)
    Returns ((B, F), (B, F)).
    """
    B, D = x.shape
    Ba, Da = xa.shape
    assert B == Ba, "fused path assumes both heads see the same batch"
    F_ = feat_dim

    if B <= jnp_fallback_batch:
        # Tiny-batch fallback: pallas_call dispatch would dominate; let XLA fuse.
        h = jnp.maximum(jnp.dot(x, w1h, precision=_PREC)
                        + jnp.dot(xa, w1a, precision=_PREC) + b1, 0.0)
        y = jnp.dot(h, w2, precision=_PREC) + b2
        return y[:, :F_], y[:, F_:]

    out_shape = (jax.ShapeDtypeStruct((B, F_), x.dtype),
                 jax.ShapeDtypeStruct((B, F_), xa.dtype))
    args = (x, xa, w1h, w1a, b1, w2, b2)

    if B <= max_batch_tile:
        # Small/medium batch: everything fits VMEM comfortably -> skip the
        # grid/pipeline machinery, DMA whole arrays once, single body call.
        vmem = pl.BlockSpec(memory_space=pltpu.MemorySpace.VMEM)
        return pl.pallas_call(
            _packed_heads_kernel,
            out_shape=out_shape,
            in_specs=[vmem] * 7,
            out_specs=(vmem, vmem),
        )(*args)

    # Large batch: tile ONLY the batch dimension. Weights/biases are
    # VMEM-resident across all grid steps (constant index_map); activations and
    # outputs stream.  Per-row streamed VMEM (f32, lane-padded) is ~2 KiB, so
    # tb=2048 double-buffered is ~8 MiB -> fits the default scoped VMEM on
    # v5e/v6e/v7x without touching vmem_limit_bytes.  (Raise vmem_limit_bytes
    # if you want tb=4096 on v6e/v7x.)
    tb = _choose_batch_tile(B, max_batch_tile)
    rowblock = lambda i: (i, 0)   # streamed: blocked on rows
    resident = lambda i: (0, 0)   # resident: same block every step
    in_specs = [
        pl.BlockSpec((tb, D), rowblock),      # x
        pl.BlockSpec((tb, Da), rowblock),     # xa
        pl.BlockSpec(w1h.shape, resident),    # (D, Hp)
        pl.BlockSpec(w1a.shape, resident),    # (Da, Hp)
        pl.BlockSpec(b1.shape, resident),     # (1, Hp)
        pl.BlockSpec(w2.shape, resident),     # (Hp, 2F)
        pl.BlockSpec(b2.shape, resident),     # (1, 2F)
    ]
    out_specs = (pl.BlockSpec((tb, F_), rowblock),
                 pl.BlockSpec((tb, F_), rowblock))
    return pl.pallas_call(
        _packed_heads_kernel,
        out_shape=out_shape,
        grid=(pl.cdiv(B, tb),),
        in_specs=in_specs,
        out_specs=out_specs,
        compiler_params=pltpu.CompilerParams(
            dimension_semantics=("parallel",)),
    )(*args)


# ---------------------------------------------------------------------------
# Parameter init / packing
# ---------------------------------------------------------------------------
def init_linear(key, in_dim, out_dim, dtype=jnp.float32):
    """torch.nn.Linear-style init. W returned pre-transposed to (in, out), b (1, out)."""
    kw, kb = jax.random.split(key)
    bound = float(in_dim) ** -0.5
    w = jax.random.uniform(kw, (in_dim, out_dim), dtype, minval=-bound, maxval=bound)
    b = jax.random.uniform(kb, (1, out_dim), dtype, minval=-bound, maxval=bound)
    return w, b


def pack_heads(hw1, hb1, hw2, hb2, aw1, ab1, aw2, ab2):
    """One-time host-side packing into the padded block-diagonal layout."""
    D = hw1.shape[0]
    Da = aw1.shape[0]
    F_ = hw2.shape[1]
    assert aw2.shape[1] == F_
    Hp = _round_up(D + Da, 128)                      # padded hidden lane count
    dt = hw1.dtype
    w1h = jnp.zeros((D, Hp), dt).at[:, :D].set(hw1)
    w1a = jnp.zeros((Da, Hp), dt).at[:, D:D + Da].set(aw1)
    b1 = (jnp.zeros((1, Hp), dt)
          .at[:, :D].set(hb1.reshape(1, D))
          .at[:, D:D + Da].set(ab1.reshape(1, Da)))
    w2 = (jnp.zeros((Hp, 2 * F_), dt)
          .at[:D, :F_].set(hw2)
          .at[D:D + Da, F_:].set(aw2))
    b2 = jnp.concatenate([hb2.reshape(1, F_), ab2.reshape(1, F_)], axis=1)
    return w1h, w1a, b1, w2, b2


class ProjectionHeadPallas:
    def __init__(self, output_dim, output_art_dim, feat_dim=128, key=None):
        if key is None:
            key = jax.random.PRNGKey(0)
        k1, k2, k3, k4 = jax.random.split(key, 4)
        self.feat_dim = feat_dim
        # Raw per-head params (kept for reference / parity checks).
        self.h_w1, self.h_b1 = init_linear(k1, output_dim, output_dim)
        self.h_w2, self.h_b2 = init_linear(k2, output_dim, feat_dim)
        self.a_w1, self.a_b1 = init_linear(k3, output_art_dim, output_art_dim)
        self.a_w2, self.a_b2 = init_linear(k4, output_art_dim, feat_dim)
        # Packed block-diagonal params used by the kernel.
        (self.w1h, self.w1a, self.b1p,
         self.w2p, self.b2p) = pack_heads(self.h_w1, self.h_b1, self.h_w2,
                                          self.h_b2, self.a_w1, self.a_b1,
                                          self.a_w2, self.a_b2)

    def __call__(self, output, output_art):
        return fused_projection_heads(
            output, output_art,
            self.w1h, self.w1a, self.b1p, self.w2p, self.b2p,
            self.feat_dim)


def _reference(x, xa, m):
    """Pure-JAX reference using the unpacked weights."""
    def head(v, w1, b1, w2, b2):
        h = jnp.maximum(jnp.dot(v, w1, precision=_PREC) + b1, 0.0)
        return jnp.dot(h, w2, precision=_PREC) + b2
    return (head(x, m.h_w1, m.h_b1, m.h_w2, m.h_b2),
            head(xa, m.a_w1, m.a_b1, m.a_w2, m.a_b2))


if __name__ == "__main__":
    key = jax.random.PRNGKey(0)
    k_in1, k_in2, k_in3, k_in4, k_params = jax.random.split(key, 5)

    output_dim = 32
    output_art_dim = 64
    feat_dim = 128
    model = ProjectionHeadPallas(output_dim, output_art_dim, feat_dim, key=k_params)

    # --- small batch: grid-free whole-array VMEM path ------------------------
    batch = 8
    output = jax.random.normal(k_in1, (batch, output_dim), dtype=jnp.float32)
    output_art = jax.random.normal(k_in2, (batch, output_art_dim), dtype=jnp.float32)

    out_cl, out_art_cl = model(output, output_art)
    jax.block_until_ready((out_cl, out_art_cl))

    ref_cl, ref_art_cl = _reference(output, output_art, model)
    assert out_cl.shape == (batch, feat_dim)
    assert out_art_cl.shape == (batch, feat_dim)
    assert jnp.allclose(out_cl, ref_cl, atol=1e-4, rtol=1e-5)
    assert jnp.allclose(out_art_cl, ref_art_cl, atol=1e-4, rtol=1e-5)

    # --- large batch: batch-tiled grid path (even step count, partial block) -
    big = 4100   # > max_batch_tile -> grid path; 4 steps of tb=1032, last partial
    xb = jax.random.normal(k_in3, (big, output_dim), dtype=jnp.float32)
    xab = jax.random.normal(k_in4, (big, output_art_dim), dtype=jnp.float32)

    out_b, out_ab = model(xb, xab)
    jax.block_until_ready((out_b, out_ab))

    ref_b, ref_ab = _reference(xb, xab, model)
    assert out_b.shape == (big, feat_dim)
    assert out_ab.shape == (big, feat_dim)
    assert jnp.allclose(out_b, ref_b, atol=1e-4, rtol=1e-5)
    assert jnp.allclose(out_ab, ref_ab, atol=1e-4, rtol=1e-5)

    print("KERNEL_OK")
</pallas_src>

<mosaic_0001>
module attributes {stable_mosaic.version = 11 : i64} {
  func.func @_packed_heads_kernel(%arg0: memref<8x32xf32, #tpu.memory_space<vmem>>, %arg1: memref<8x64xf32, #tpu.memory_space<vmem>>, %arg2: memref<32x128xf32, #tpu.memory_space<vmem>>, %arg3: memref<64x128xf32, #tpu.memory_space<vmem>>, %arg4: memref<1x128xf32, #tpu.memory_space<vmem>>, %arg5: memref<128x256xf32, #tpu.memory_space<vmem>>, %arg6: memref<1x256xf32, #tpu.memory_space<vmem>>, %arg7: memref<8x128xf32, #tpu.memory_space<vmem>>, %arg8: memref<8x128xf32, #tpu.memory_space<vmem>>) attributes {dimension_semantics = [], scalar_prefetch = 0 : i64, scratch_operands = 0 : i64, tpu.core_type = #tpu.core_type<tc>} {
    %c0 = arith.constant 0 : index
    %c0_0 = arith.constant 0 : index
    %0 = vector.load %arg0[%c0, %c0_0] : memref<8x32xf32, #tpu.memory_space<vmem>>, vector<8x32xf32>
    %c0_1 = arith.constant 0 : index
    %c0_2 = arith.constant 0 : index
    %1 = vector.load %arg2[%c0_1, %c0_2] : memref<32x128xf32, #tpu.memory_space<vmem>>, vector<32x128xf32>
    %cst = arith.constant dense<0.000000e+00> : vector<8x128xf32>
    %2 = tpu.matmul %0, %1, %cst {dimension_numbers = #tpu.dot_dimension_numbers<[1], [0], [0], [1], [0, 0, 1, 1], [], []>, precision = #tpu.contract_precision<fp32>} : vector<8x32xf32>, vector<32x128xf32>, vector<8x128xf32> -> vector<8x128xf32>
    %c0_3 = arith.constant 0 : index
    %c0_4 = arith.constant 0 : index
    %3 = vector.load %arg1[%c0_3, %c0_4] : memref<8x64xf32, #tpu.memory_space<vmem>>, vector<8x64xf32>
    %c0_5 = arith.constant 0 : index
    %c0_6 = arith.constant 0 : index
    %4 = vector.load %arg3[%c0_5, %c0_6] : memref<64x128xf32, #tpu.memory_space<vmem>>, vector<64x128xf32>
    %cst_7 = arith.constant dense<0.000000e+00> : vector<8x128xf32>
    %5 = tpu.matmul %3, %4, %cst_7 {dimension_numbers = #tpu.dot_dimension_numbers<[1], [0], [0], [1], [0, 0, 1, 1], [], []>, precision = #tpu.contract_precision<fp32>} : vector<8x64xf32>, vector<64x128xf32>, vector<8x128xf32> -> vector<8x128xf32>
    %6 = arith.addf %2, %5 : vector<8x128xf32>
    %c0_8 = arith.constant 0 : index
    %c0_9 = arith.constant 0 : index
    %7 = vector.load %arg4[%c0_8, %c0_9] : memref<1x128xf32, #tpu.memory_space<vmem>>, vector<1x128xf32>
    %8 = vector.broadcast %7 : vector<1x128xf32> to vector<8x128xf32>
    %9 = arith.addf %6, %8 : vector<8x128xf32>
    %cst_10 = arith.constant 0.000000e+00 : f32
    %10 = vector.broadcast %cst_10 : f32 to vector<8x128xf32>
    %11 = arith.maximumf %9, %10 : vector<8x128xf32>
    %c0_11 = arith.constant 0 : index
    %c0_12 = arith.constant 0 : index
    %12 = vector.load %arg5[%c0_11, %c0_12] : memref<128x256xf32, #tpu.memory_space<vmem>>, vector<128x256xf32>
    %cst_13 = arith.constant dense<0.000000e+00> : vector<8x256xf32>
    %13 = tpu.matmul %11, %12, %cst_13 {dimension_numbers = #tpu.dot_dimension_numbers<[1], [0], [0], [1], [0, 0, 1, 1], [], []>, precision = #tpu.contract_precision<fp32>} : vector<8x128xf32>, vector<128x256xf32>, vector<8x256xf32> -> vector<8x256xf32>
    %c0_14 = arith.constant 0 : index
    %c0_15 = arith.constant 0 : index
    %14 = vector.load %arg6[%c0_14, %c0_15] : memref<1x256xf32, #tpu.memory_space<vmem>>, vector<1x256xf32>
    %15 = vector.broadcast %14 : vector<1x256xf32> to vector<8x256xf32>
    %16 = arith.addf %13, %15 : vector<8x256xf32>
    %17 = vector.extract_strided_slice %16 {offsets = [0, 0], sizes = [8, 128], strides = [1, 1]} : vector<8x256xf32> to vector<8x128xf32>
    %c0_16 = arith.constant 0 : index
    %c0_17 = arith.constant 0 : index
    %18 = vector.load %arg7[%c0_16, %c0_17] : memref<8x128xf32, #tpu.memory_space<vmem>>, vector<8x128xf32>
    tpu.vector_store %arg7[%c0_16, %c0_17], %17 {strides = array<i32>} : memref<8x128xf32, #tpu.memory_space<vmem>>, vector<8x128xf32>,
    %19 = vector.extract_strided_slice %16 {offsets = [0, 128], sizes = [8, 128], strides = [1, 1]} : vector<8x256xf32> to vector<8x128xf32>
    %c0_18 = arith.constant 0 : index
    %c0_19 = arith.constant 0 : index
    %20 = vector.load %arg8[%c0_18, %c0_19] : memref<8x128xf32, #tpu.memory_space<vmem>>, vector<8x128xf32>
    tpu.vector_store %arg8[%c0_18, %c0_19], %19 {strides = array<i32>} : memref<8x128xf32, #tpu.memory_space<vmem>>, vector<8x128xf32>,
    return
  }
}

</mosaic_0001>

<bundles_post_ra>
// kernel: tpu_custom_call.1
= control target key start
LH: loop header
LB: loop body
LE: loop exit
PB: predicated region body
PF: predicated region fallthrough
CT: control target
= control target key end

     0   :  { %14 = vsyncpa [#allocation3], 0  ;;  %s3579_s0 = inlined_call_operand.hbm [shape: f32[8,32], index: 0, kind: input, shape index: {}]   ;;  %s3580_s1 = inlined_call_operand.hbm [shape: f32[8,64], index: 1, kind: input, shape index: {}]   ;;  %s3581_s2 = inlined_call_operand.hbm [shape: f32[32,128], index: 2, kind: input, shape index: {}]   ;;  %s3582_s3 = inlined_call_operand.hbm [shape: f32[64,128], index: 3, kind: input, shape index: {}]   ;;  %s3583_s4 = inlined_call_operand.vmem [shape: f32[1,128], index: 4, kind: input, shape index: {}]   ;;  %s3584_s5 = inlined_call_operand.hbm [shape: f32[128,256], index: 5, kind: input, shape index: {}]   ;;  %s3585_s6 = inlined_call_operand.vmem [shape: f32[1,256], index: 6, kind: input, shape index: {}]   ;;  %s3586_s7 = inlined_call_operand.hbm [shape: f32[8,128], index: 7, kind: output, shape index: {0}]   ;;  %s3587_s8 = inlined_call_operand.hbm [shape: f32[8,128], index: 8, kind: output, shape index: {1}]  }
   0x1   :  { %15 = vsyncpa [#allocation6], 0 }
   0x2   :  { %16 = vsyncpa [#allocation9], 0 }
   0x3   :  { %17 = vsyncpa [#allocation4], 0 }
   0x4   :  { %18 = vsyncpa [#allocation13], 0  ;;  %s2834_s27 = smov [#allocation5]   ;;  %s2670_s9 = scalar_lea.hbm %s3580_s1, 128 }
   0x5   :  { %s35_s28 = sshll.u32 %s2834_s27, 4  ;;  %p2671_p0 = scmp.ne.s32.totalorder %s3580_s1, %s2670_s9  ;;  %s36_s28 = int_to_ptr.vmem [resolvable:$true] %s35_s28 }
   0x6   :  { %p2674_p1 = scmp.lt.u32.totalorder %s2670_s9, %s3580_s1 }
   0x8   :  { %p2676_p2 = pnand %p2674_p1, %p2671_p0 }
   0xa   :  { %2679 = shalt.err (!%p2676_p2)
}
   0xb   :  { %s2680_s14 = scalar_lea.vmem %s36_s28, 128  ;;  %p2685_p4 = scmp.lt.s32.totalorder %s36_s28, %s36_s28 }
   0xc   :  { %p2681_p3 = scmp.ne.s32.totalorder %s36_s28, %s2680_s14  ;;  %p2686_p5 = scmp.lt.s32.totalorder %s2680_s14, %s2680_s14 }
   0xe   :  { %p2687_p6 = por %p2686_p5, %p2685_p4 }
  0x10   :  { %p2688_p7 = pnand %p2687_p6, %p2681_p3 }
  0x12   :  { %2691 = shalt.err (!%p2688_p7)
}
  0x13   :  { %38 = dma.hbm_to_vmem [thread:$0]  %s3580_s1, 128, %s36_s28, [#allocation6]  }
  0x14   :  { %s2835_s17 = smov [#allocation8]   ;;  %s2836_s19 = smov [#allocation2]  }
  0x15   :  { %s56_s18 = sshll.u32 %s2835_s17, 4  ;;  %s25_s20 = sshll.u32 %s2836_s19, 4  ;;  %s57_s18 = int_to_ptr.vmem [resolvable:$true] %s56_s18  ;;  %s26_s20 = int_to_ptr.vmem [resolvable:$true] %s25_s20 }
  0x16   :  { %s2692_s23 = scalar_lea.hbm %s3582_s3, 1024 }
  0x17   :  { %p2693_p8 = scmp.ne.s32.totalorder %s3582_s3, %s2692_s23  ;;  %p2696_p9 = scmp.lt.u32.totalorder %s2692_s23, %s3582_s3 }
  0x19   :  { %p2698_p10 = pnand %p2696_p9, %p2693_p8 }
  0x1b   :  { %2701 = shalt.err (!%p2698_p10)
}
  0x1c   :  { %s2702_s1 = scalar_lea.vmem %s57_s18, 1024  ;;  %p2707_p12 = scmp.lt.s32.totalorder %s57_s18, %s57_s18 }
  0x1d   :  { %p2703_p11 = scmp.ne.s32.totalorder %s57_s18, %s2702_s1  ;;  %p2708_p13 = scmp.lt.s32.totalorder %s2702_s1, %s2702_s1 }
  0x1f   :  { %p2709_p0 = por %p2708_p13, %p2707_p12 }
  0x21   :  { %p2710_p1 = pnand %p2709_p0, %p2703_p11 }
  0x23   :  { %2713 = shalt.err (!%p2710_p1)
}
  0x24   :  { %s2837_s28 = smov 128   ;;  %s2838_s29 = smov 8  }
  0x25   :  { %62 = dma.hbm_to_vmem [thread:$0]  %s3582_s3, 1024, %s57_s18, [#allocation9], %s2837_s28, %s2837_s28, %s2838_s29  }
  0x26   :  { %s2714_s12 = scalar_lea.hbm %s3579_s0, 128 }
  0x27   :  { %p2715_p2 = scmp.ne.s32.totalorder %s3579_s0, %s2714_s12  ;;  %p2718_p3 = scmp.lt.u32.totalorder %s2714_s12, %s3579_s0 }
  0x29   :  { %p2720_p4 = pnand %p2718_p3, %p2715_p2 }
  0x2b   :  { %2723 = shalt.err (!%p2720_p4)
}
  0x2c   :  { %s2724_s17 = scalar_lea.vmem %s26_s20, 128  ;;  %p2729_p6 = scmp.lt.s32.totalorder %s26_s20, %s26_s20 }
  0x2d   :  { %p2725_p5 = scmp.ne.s32.totalorder %s26_s20, %s2724_s17  ;;  %p2730_p7 = scmp.lt.s32.totalorder %s2724_s17, %s2724_s17 }
  0x2f   :  { %p2731_p8 = por %p2730_p7, %p2729_p6 }
  0x31   :  { %p2732_p9 = pnand %p2731_p8, %p2725_p5 }
  0x33   :  { %2735 = shalt.err (!%p2732_p9)
}
  0x34   :  { %28 = dma.hbm_to_vmem [thread:$0]  %s3579_s0, 128, %s26_s20, [#allocation3]  }
  0x35   :  { %s2839_s19 = smov [#allocation7]   ;;  %s2840_s22 = smov [#allocation10]  }
  0x36   :  { %s44_s21 = sshll.u32 %s2839_s19, 4  ;;  %s70_s23 = sshll.u32 %s2840_s22, 4  ;;  %s45_s21 = int_to_ptr.vmem [resolvable:$true] %s44_s21  ;;  %s71_s23 = int_to_ptr.vmem [resolvable:$true] %s70_s23 }
  0x37   :  { %s2736_s26 = scalar_lea.hbm %s3581_s2, 512 }
  0x38   :  { %p2737_p10 = scmp.ne.s32.totalorder %s3581_s2, %s2736_s26  ;;  %p2740_p11 = scmp.lt.u32.totalorder %s2736_s26, %s3581_s2 }
  0x3a   :  { %p2742_p12 = pnand %p2740_p11, %p2737_p10 }
  0x3c   :  { %2745 = shalt.err (!%p2742_p12)
}
  0x3d   :  { %s2746_s0 = scalar_lea.vmem %s45_s21, 512  ;;  %p2751_p0 = scmp.lt.s32.totalorder %s45_s21, %s45_s21 }
  0x3e   :  { %p2747_p13 = scmp.ne.s32.totalorder %s45_s21, %s2746_s0  ;;  %p2752_p1 = scmp.lt.s32.totalorder %s2746_s0, %s2746_s0 }
  0x40   :  { %p2753_p2 = por %p2752_p1, %p2751_p0 }
  0x42   :  { %p2754_p3 = pnand %p2753_p2, %p2747_p13 }
  0x44   :  { %2757 = shalt.err (!%p2754_p3)
}
  0x45   :  { %50 = dma.hbm_to_vmem [thread:$0]  %s3581_s2, 512, %s45_s21, [#allocation6], %s2837_s28, %s2837_s28, %s2838_s29  }
  0x46   :  { %s2758_s13 = scalar_lea.hbm %s3584_s5, 4096 }
  0x47   :  { %p2759_p4 = scmp.ne.s32.totalorder %s3584_s5, %s2758_s13  ;;  %p2762_p5 = scmp.lt.u32.totalorder %s2758_s13, %s3584_s5 }
  0x49   :  { %p2764_p6 = pnand %p2762_p5, %p2759_p4 }
  0x4b   :  { %2767 = shalt.err (!%p2764_p6)
}
  0x4c   :  { %s2768_s3 = scalar_lea.vmem %s71_s23, 4096  ;;  %p2773_p8 = scmp.lt.s32.totalorder %s71_s23, %s71_s23 }
  0x4d   :  { %p2769_p7 = scmp.ne.s32.totalorder %s71_s23, %s2768_s3  ;;  %p2774_p9 = scmp.lt.s32.totalorder %s2768_s3, %s2768_s3 }
  0x4f   :  { %p2775_p10 = por %p2774_p9, %p2773_p8 }
  0x51   :  { %p2776_p11 = pnand %p2775_p10, %p2769_p7 }
  0x53   :  { %2779 = shalt.err (!%p2776_p11)
}
  0x54   :  { %s2841_s2 = smov 256   ;;  %s2842_s28 = smov 16  }
  0x55   :  { %76 = dma.hbm_to_vmem [thread:$0]  %s3584_s5, 4096, %s71_s23, [#allocation9], %s2841_s2, %s2841_s2, %s2842_s28  }
  0x56   :  { %2824 = dma.done.wait [#allocation3], 128  }
  0x57   :  { %2825 = vsyncadd [#allocation3], 4294967168 }
  0x58   :  { %2826 = dma.done.wait [#allocation6], 640  }
  0x59   :  { %2827 = vsyncadd [#allocation6], 4294966656 }
  0x5a   :  { %2828 = dma.done.wait [#allocation9], 5120  }
  0x5b   :  { %2829 = vsyncadd [#allocation9], 4294962176  ;;  %v2843_v0 = vmov 0.0|0.0   ;;  %vm2844_vm0 = vmmov 0   ;;  %v3588_v1 = vmov 0.0   ;;  %v100_v2 = vld [vmem:[#allocation8] sm:$0xff] }
  0x5c   :  { %2344 = vmatprep.subr.bf16.mxu0 %v2843_v0  ;;  %2356 = vmatprep.subr.bf16.mxu1 %v2843_v0  ;;  %v101_v3 = vld [vmem:[#allocation8 + $0x8] sm:$0xff]  ;;  %v102_v4 = vld [vmem:[#allocation8 + $0x10] sm:$0xff]  ;;  %v113_v5 = vand.u32 4294901760, %v100_v2  ;;  %v103_v7 = vld [vmem:[#allocation8 + $0x18] sm:$0xff]  ;;  %vm108_vm1 = vcmask 523264   ;;  %vm649_vm2 = vcmask 261120  }
  0x5d   :  { %2180 = vmatprep.mubr.msk.f32.mxu0 %vm2844_vm0, %v3588_v1  ;;  %2199 = vmatprep.mubr.msk.f32.mxu1 %vm2844_vm0, %v3588_v1  ;;  %v116_v6 = vand.u32 4294901760, %v101_v3  ;;  %v119_v8 = vand.u32 4294901760, %v102_v4  ;;  %v104_v9 = vld [vmem:[#allocation8 + $0x20] sm:$0xff]  ;;  %v105_v10 = vld [vmem:[#allocation8 + $0x28] sm:$0xff]  ;;  %v122_v11 = vand.u32 4294901760, %v103_v7  ;;  %v106_v14 = vld [vmem:[#allocation8 + $0x30] sm:$0xff] }
  0x5e   :  { %v125_v12 = vand.u32 4294901760, %v104_v9  ;;  %v128_v13 = vand.u32 4294901760, %v105_v10  ;;  %v2967_v16 = vsub.f32 %v100_v2, %v113_v5  ;;  %v107_v19 = vld [vmem:[#allocation8 + $0x38] sm:$0xff]  ;;  %v131_v27 = vand.u32 4294901760, %v106_v14  ;;  %s2846_s22 = smov [#allocation11]   ;;  %s2847_s24 = smov [#allocation12]  }
  0x5f   :  { %v2965_v15 = vpack.c.bf16 %v116_v6, %v113_v5  ;;  %v2969_v17 = vsub.f32 %v101_v3, %v116_v6  ;;  %v2971_v18 = vsub.f32 %v102_v4, %v119_v8  ;;  %v99_v20 = vld [vmem:[#allocation5] sm:$0xff]  ;;  %v2973_v21 = vpack.c.bf16 %v122_v11, %v119_v8  ;;  %v95_v8 = vld [vmem:[#allocation7] sm:$0xff]  ;;  %s2054_s23 = sshll.u32 %s2846_s22, 4  ;;  %s2064_s25 = sshll.u32 %s2847_s24, 4  ;;  %s2055_s23 = int_to_ptr.vmem [resolvable:$true] %s2054_s23  ;;  %s2065_s25 = int_to_ptr.vmem [resolvable:$true] %s2064_s25 }
  0x60   :  { %v2975_v22 = vsub.f32 %v103_v7, %v122_v11  ;;  %v2977_v23 = vsub.f32 %v104_v9, %v125_v12  ;;  %v2980_v24 = vsub.f32 %v105_v10, %v128_v13  ;;  %v198_v25 = vand.u32 4294901760, %v2967_v16  ;;  %v96_v9 = vld [vmem:[#allocation7 + $0x8] sm:$0xff]  ;;  %v94_v10 = vld [vmem:[#allocation2] sm:$0xff]  ;;  %p2785_p13 = scmp.lt.s32.totalorder %s2055_s23, %s2055_s23 }
  0x61   :  { %2346 = vmatpush3.bf16.msra.mxu0 %v2965_v15  ;;  %v205_v26 = vand.u32 4294901760, %v2969_v17  ;;  %v134_v28 = vand.u32 4294901760, %v107_v19  ;;  %v212_v29 = vand.u32 4294901760, %v2971_v18  ;;  %v110_v31 = vsel %vm108_vm1, %v99_v20, 0 }
  0x62   :  { %2347 = vmatprep.subr.bf16.mxu0 %v2843_v0  ;;  %v219_v30 = vand.u32 4294901760, %v2975_v22  ;;  %v199_v32 = vsub.f32 %v2967_v16, %v198_v25  ;;  %v2994_v34 = vsub.f32 %v106_v14, %v131_v27  ;;  %v2996_v35 = vand.u32 4294901760, %v110_v31 }
  0x63   :  { %v206_v33 = vsub.f32 %v2969_v17, %v205_v26  ;;  %v2998_v36 = vpack.c.bf16 %v128_v13, %v125_v12  ;;  %v3000_v37 = vsub.f32 %v107_v19, %v134_v28  ;;  %v213_v38 = vsub.f32 %v2971_v18, %v212_v29 }
  0x64   :  { %v220_v39 = vsub.f32 %v2975_v22, %v219_v30  ;;  %v200_v40 = vand.u32 4294901760, %v199_v32  ;;  %v3010_v42 = vsub.f32 %v110_v31, %v2996_v35  ;;  %v226_v43 = vand.u32 4294901760, %v2977_v23 }
  0x65   :  { %2349 = vmatpush3.bf16.msra.mxu0 %v2973_v21  ;;  %v207_v41 = vand.u32 4294901760, %v206_v33  ;;  %v214_v44 = vand.u32 4294901760, %v213_v38  ;;  %v233_v46 = vand.u32 4294901760, %v2980_v24  ;;  %v240_v50 = vand.u32 4294901760, %v2994_v34 }
  0x66   :  { %2350 = vmatprep.subr.bf16.mxu0 %v2843_v0  ;;  %v221_v45 = vand.u32 4294901760, %v220_v39  ;;  %v187_v48 = vand.u32 4294901760, %v3010_v42  ;;  %v227_v49 = vsub.f32 %v2977_v23, %v226_v43  ;;  %v3020_v51 = vpack.c.bf16 %v134_v28, %v131_v27 }
  0x67   :  { %v2357_v47 = vpack.c.bf16 %v207_v41, %v200_v40  ;;  %v234_v52 = vsub.f32 %v2980_v24, %v233_v46  ;;  %v247_v53 = vand.u32 4294901760, %v3000_v37  ;;  %v241_v57 = vsub.f32 %v2994_v34, %v240_v50 }
  0x68   :  { %v2360_v54 = vpack.c.bf16 %v221_v45, %v214_v44  ;;  %v188_v55 = vsub.f32 %v3010_v42, %v187_v48  ;;  %v228_v56 = vand.u32 4294901760, %v227_v49  ;;  %v2369_v62 = vpack.c.bf16 %v2969_v17, %v2967_v16  ;;  %v97_v16 = vld [vmem:[#allocation7 + $0x10] sm:$0xff]  ;;  %v98_v17 = vld [vmem:[#allocation7 + $0x18] sm:$0xff] }
  0x69   :  { %2352 = vmatpush3.bf16.msra.mxu0 %v2998_v36  ;;  %2358 = vmatpush3.bf16.msra.mxu1 %v2357_v47  ;;  %v235_v58 = vand.u32 4294901760, %v234_v52  ;;  %v248_v59 = vsub.f32 %v3000_v37, %v247_v53  ;;  %v242_v63 = vand.u32 4294901760, %v241_v57  ;;  %v2372_v4 = vpack.c.bf16 %v2975_v22, %v2971_v18 }
  0x6a   :  { %2353 = vmatprep.subr.bf16.mxu0 %v2843_v0  ;;  %2359 = vmatprep.subr.bf16.mxu1 %v2843_v0  ;;  %v189_v60 = vand.u32 4294901760, %v188_v55  ;;  %v2375_v5 = vpack.c.bf16 %v2980_v24, %v2977_v23  ;;  %v2378_v6 = vpack.c.bf16 %v3000_v37, %v2994_v34  ;;  %v2393_v7 = vpack.c.bf16 %v205_v26, %v198_v25  ;;  %v1149_v55 = vld [vmem:[#allocation10 + $0x10] sm:$0xff] }
  0x6b   :  { %v2363_v61 = vpack.c.bf16 %v235_v58, %v228_v56  ;;  %v249_v2 = vand.u32 4294901760, %v248_v59  ;;  %v2396_v11 = vpack.c.bf16 %v219_v30, %v212_v29  ;;  %v654_v12 = vand.u32 4294901760, %v95_v8 }
  0x6c   :  { %v657_v13 = vand.u32 4294901760, %v96_v9  ;;  %v651_v14 = vsel %vm649_vm2, %v94_v10, 0  ;;  %v2399_v18 = vpack.c.bf16 %v233_v46, %v226_v43  ;;  %v660_v25 = vand.u32 4294901760, %v97_v16  ;;  %v1158_v10 = vld [vmem:[#allocation10 + $0x58] sm:$0xff] }
  0x6d   :  { %2355 = vmatpush3.bf16.msra.mxu0 %v3020_v51  ;;  %2361 = vmatpush3.bf16.msra.mxu1 %v2360_v54  ;;  %v2366_v3 = vpack.c.bf16 %v249_v2, %v242_v63  ;;  %v3082_v19 = vand.u32 4294901760, %v651_v14  ;;  %v734_v20 = vsub.f32 %v95_v8, %v654_v12  ;;  %v663_v26 = vand.u32 4294901760, %v98_v17  ;;  %v1147_v54 = vld [vmem:[#allocation10] sm:$0xff] }
  0x6e   :  { %2362 = vmatprep.subr.bf16.mxu1 %v2843_v0  ;;  %2368 = vmatprep.subr.bf16.mxu0 %v2843_v0  ;;  %v741_v22 = vsub.f32 %v96_v9, %v657_v13  ;;  %v2402_v23 = vpack.c.bf16 %v247_v53, %v240_v50  ;;  %v748_v27 = vsub.f32 %v97_v16, %v660_v25  ;;  %v3140_v50 = vld [vmem:[#allocation10 + $0x8] sm:$0xff]  ;;  %v1193_v56 = vand.u32 4294901760, %v1147_v54 }
  0x6f   :  { %v3094_v24 = vsub.f32 %v651_v14, %v3082_v19  ;;  %v755_v28 = vsub.f32 %v98_v17, %v663_v26  ;;  %v735_v29 = vand.u32 4294901760, %v734_v20  ;;  %v2417_v31 = vpack.c.bf16 %v657_v13, %v654_v12  ;;  %v1156_v9 = vld [vmem:[#allocation10 + $0x48] sm:$0xff]  ;;  %v1155_v13 = vld [vmem:[#allocation10 + $0x40] sm:$0xff]  ;;  %v1157_v14 = vld [vmem:[#allocation10 + $0x50] sm:$0xff] }
  0x70   :  { %2181 = vmatmul.mubr.f32.vlgmr.msra.gmra.mrb[0].mxu0 %v189_v60  ;;  %v742_v30 = vand.u32 4294901760, %v741_v22  ;;  %v2420_v38 = vpack.c.bf16 %v663_v26, %v660_v25  ;;  %v2429_v45 = vpack.c.bf16 %v741_v22, %v734_v20  ;;  %v1191_v52 = vand.u32 4294901760, %v3140_v50  ;;  %v1152_v60 = vld [vmem:[#allocation10 + $0x28] sm:$0xff] }
  0x71   :  { %2364 = vmatpush3.bf16.msra.mxu1 %v2363_v61  ;;  %2370 = vmatpush3.bf16.msra.mxu0 %v2369_v62  ;;  %v724_v32 = vand.u32 4294901760, %v3094_v24  ;;  %v736_v33 = vsub.f32 %v734_v20, %v735_v29  ;;  %v756_v37 = vand.u32 4294901760, %v755_v28  ;;  %v1197_v57 = vand.u32 4294901760, %v1149_v55  ;;  %v1154_v61 = vld [vmem:[#allocation10 + $0x38] sm:$0xff] }
  0x72   :  { %2365 = vmatprep.subr.bf16.mxu1 %v2843_v0  ;;  %2371 = vmatprep.subr.bf16.mxu0 %v2843_v0  ;;  %v743_v34 = vsub.f32 %v741_v22, %v742_v30  ;;  %v2441_v49 = vpack.c.bf16 %v742_v30, %v735_v29  ;;  %v3154_v59 = vsub.f32 %v1147_v54, %v1193_v56  ;;  %v1199_v63 = vand.u32 4294901760, %v1152_v60 }
  0x73   :  { %2218 = vmatprep.mubr.msk.f32.mxu0 %vm2844_vm0, %v3588_v1  ;;  %v725_v39 = vsub.f32 %v3094_v24, %v724_v32  ;;  %v737_v40 = vand.u32 4294901760, %v736_v33  ;;  %v3152_v58 = vpack.c.bf16 %v1197_v57, %v1193_v56  ;;  %v3157_v62 = vsub.f32 %v1149_v55, %v1197_v57  ;;  %v1161_v33 = vld [vmem:[#allocation10 + $0x70] sm:$0xff]  ;;  %v1168_v56 = vld [vmem:[#allocation10 + $0xa8] sm:$0xff]  ;;  %v1170_v57 = vld [vmem:[#allocation10 + $0xb8] sm:$0xff] }
  0x74   :  { %v744_v41 = vand.u32 4294901760, %v743_v34  ;;  %v1203_v2 = vand.u32 4294901760, %v1154_v61  ;;  %v1211_v12 = vand.u32 4294901760, %v1158_v10  ;;  %v3168_v16 = vsub.f32 %v1152_v60, %v1199_v63 }
  0x75   :  { %2367 = vmatpush3.bf16.msra.mxu1 %v2366_v3  ;;  %2373 = vmatpush3.bf16.msra.mxu0 %v2372_v4  ;;  %v726_v43 = vand.u32 4294901760, %v725_v39  ;;  %3613 = vst [vmem:[#allocation20_spill] sm:$0xff] %v3152_v58  ;;  %v1151_v3 = vld [vmem:[#allocation10 + $0x20] sm:$0xff]  ;;  %v1153_v4 = vld [vmem:[#allocation10 + $0x30] sm:$0xff]  ;;  %v1209_v22 = vand.u32 4294901760, %v1155_v13  ;;  %v1213_v25 = vand.u32 4294901760, %v1157_v14 }
  0x76   :  { %2374 = vmatprep.subr.bf16.mxu0 %v2843_v0  ;;  %2380 = vmatprep.subr.bf16.mxu1 %v2843_v0  ;;  %v2423_v44 = vpack.c.bf16 %v744_v41, %v737_v40  ;;  %v3170_v17 = vsub.f32 %v1154_v61, %v1203_v2  ;;  %v1164_v40 = vld [vmem:[#allocation10 + $0x88] sm:$0xff]  ;;  %v1166_v41 = vld [vmem:[#allocation10 + $0x98] sm:$0xff] }
  0x77   :  { %v3187_v29 = vsub.f32 %v1155_v13, %v1209_v22  ;;  %v3189_v30 = vsub.f32 %v1157_v14, %v1213_v25  ;;  %v1174_v13 = vld [vmem:[#allocation10 + $0xd8] sm:$0xff] }
  0x78   :  { %2200 = vmatmul.mubr.f32.vlgmr.msra.gmra.mrb[0].mxu1 %v2996_v35 }
  0x79   :  { %2376 = vmatpush3.bf16.msra.mxu0 %v2375_v5  ;;  %2382 = vmatpush3.bf16.msra.mxu1 %v2965_v15  ;;  %v1201_v5 = vand.u32 4294901760, %v1151_v3 }
  0x7a   :  { %2377 = vmatprep.subr.bf16.mxu0 %v2843_v0  ;;  %2383 = vmatprep.subr.bf16.mxu1 %v2843_v0 }
  0x7b   :  { %2237 = vmatprep.mubr.msk.f32.mxu1 %vm2844_vm0, %v3588_v1 }
  0x7d   :  { %2379 = vmatpush3.bf16.msra.mxu0 %v2378_v6  ;;  %2385 = vmatpush3.bf16.msra.mxu1 %v2973_v21  ;;  %v1205_v6 = vand.u32 4294901760, %v1153_v4 }
  0x7e   :  { %2386 = vmatprep.subr.bf16.mxu1 %v2843_v0  ;;  %2392 = vmatprep.subr.bf16.mxu0 %v2843_v0 }
  0x7f   :  { %v3164_v8 = vpack.c.bf16 %v1205_v6, %v1201_v5 }
  0x80   :  { %2219 = vmatmul.mubr.f32.vlgmr.msra.gmra.mrb[2].mxu0 %v3010_v42 }
  0x81   :  { %2388 = vmatpush3.bf16.msra.mxu1 %v2998_v36  ;;  %2394 = vmatpush3.bf16.msra.mxu0 %v2393_v7  ;;  %v3162_v7 = vpack.c.bf16 %v1203_v2, %v1199_v63  ;;  %3615 = vst [vmem:[#allocation22_spill] sm:$0xff] %v3164_v8  ;;  %v1231_v2 = vand.u32 4294901760, %v1168_v56 }
  0x82   :  { %2389 = vmatprep.subr.bf16.mxu1 %v2843_v0  ;;  %2395 = vmatprep.subr.bf16.mxu0 %v2843_v0 }
  0x83   :  { %2256 = vmatprep.mubr.msk.f32.mxu0 %vm2844_vm0, %v3588_v1  ;;  %3614 = vst [vmem:[#allocation21_spill] sm:$0xff] %v3162_v7 }
  0x85   :  { %2391 = vmatpush3.bf16.msra.mxu1 %v3020_v51  ;;  %2397 = vmatpush3.bf16.msra.mxu0 %v2396_v11  ;;  %v1207_v11 = vand.u32 4294901760, %v1156_v9 }
  0x86   :  { %2398 = vmatprep.subr.bf16.mxu0 %v2843_v0  ;;  %2404 = vmatprep.subr.bf16.mxu1 %v2843_v0 }
  0x87   :  { %v3177_v20 = vpack.c.bf16 %v1211_v12, %v1207_v11  ;;  %v3180_v26 = vsub.f32 %v1156_v9, %v1207_v11 }
  0x88   :  { %2238 = vmatmul.mubr.f32.vlgmr.msra.gmra.mrb[2].mxu1 %v187_v48  ;;  %v2432_v48 = vpack.c.bf16 %v755_v28, %v748_v27 }
  0x89   :  { %2400 = vmatpush3.bf16.msra.mxu0 %v2399_v18  ;;  %2406 = vmatpush3.bf16.msra.mxu1 %v2965_v15  ;;  %v749_v15 = vand.u32 4294901760, %v748_v27  ;;  %v3172_v18 = vsub.f32 %v1151_v3, %v1201_v5  ;;  %3616 = vst [vmem:[#allocation23_spill] sm:$0xff] %v3177_v20  ;;  %v1167_v3 = vld [vmem:[#allocation10 + $0xa0] sm:$0xff]  ;;  %v1235_v5 = vand.u32 4294901760, %v1170_v57 }
  0x8a   :  { %2401 = vmatprep.subr.bf16.mxu0 %v2843_v0  ;;  %2407 = vmatprep.subr.bf16.mxu1 %v2843_v0 }
  0x8b   :  { %2275 = vmatprep.mubr.msk.f32.mxu1 %vm2844_vm0, %v3588_v1  ;;  %v750_v42 = vsub.f32 %v748_v27, %v749_v15  ;;  %v1162_v27 = vld [vmem:[#allocation10 + $0x78] sm:$0xff] }
  0x8c   :  { %v1219_v34 = vand.u32 4294901760, %v1162_v27 }
  0x8d   :  { %2403 = vmatpush3.bf16.msra.mxu0 %v2402_v23  ;;  %2409 = vmatpush3.bf16.msra.mxu1 %v2973_v21  ;;  %v757_v21 = vsub.f32 %v755_v28, %v756_v37  ;;  %v751_v46 = vand.u32 4294901760, %v750_v42  ;;  %v3182_v23 = vsub.f32 %v1158_v10, %v1211_v12  ;;  %v3185_v28 = vpack.c.bf16 %v1213_v25, %v1209_v22  ;;  %v1172_v12 = vld [vmem:[#allocation10 + $0xc8] sm:$0xff]  ;;  %v1171_v25 = vld [vmem:[#allocation10 + $0xc0] sm:$0xff] }
  0x8e   :  { %2410 = vmatprep.subr.bf16.mxu1 %v2843_v0  ;;  %2416 = vmatprep.subr.bf16.mxu0 %v2843_v0  ;;  %v1223_v42 = vand.u32 4294901760, %v1164_v40  ;;  %v3225_v10 = vpack.c.bf16 %v1235_v5, %v1231_v2  ;;  %v1239_v14 = vand.u32 4294901760, %v1172_v12  ;;  %v1243_v22 = vand.u32 4294901760, %v1174_v13 }
  0x8f   :  { %3617 = vst [vmem:[#allocation24_spill] sm:$0xff] %v3185_v28 }
  0x90   :  { %2257 = vmatmul.mubr.f32.vlgmr.msra.gmra.mrb[4].mxu0 %v2996_v35  ;;  %v3211_v54 = vsub.f32 %v1164_v40, %v1223_v42  ;;  %3622 = vst [vmem:[#allocation29_spill] sm:$0xff] %v3225_v10 }
  0x91   :  { %2412 = vmatpush3.bf16.msra.mxu1 %v2998_v36  ;;  %2418 = vmatpush3.bf16.msra.mxu0 %v2417_v31  ;;  %v758_v36 = vand.u32 4294901760, %v757_v21  ;;  %v1227_v21 = vand.u32 4294901760, %v1166_v41 }
  0x92   :  { %2413 = vmatprep.subr.bf16.mxu1 %v2843_v0  ;;  %2419 = vmatprep.subr.bf16.mxu0 %v2843_v0 }
  0x93   :  { %2286 = vmatprep.mubr.msk.f32.mxu0 %vm2844_vm0, %v3588_v1  ;;  %v2426_v47 = vpack.c.bf16 %v758_v36, %v751_v46  ;;  %v3200_v46 = vsub.f32 %v1162_v27, %v1219_v34  ;;  %v3213_v55 = vsub.f32 %v1166_v41, %v1227_v21  ;;  %v1241_v27 = vand.u32 4294901760, %v1171_v25 }
  0x95   :  { %2415 = vmatpush3.bf16.msra.mxu1 %v3020_v51  ;;  %2421 = vmatpush3.bf16.msra.mxu0 %v2420_v38  ;;  %v3142_v51 = vld [vmem:[#allocation10 + $0x18] sm:$0xff] }
  0x96   :  { %2422 = vmatprep.subr.bf16.mxu1 %v2843_v0  ;;  %2428 = vmatprep.subr.bf16.mxu0 %v2843_v0  ;;  %v1195_v53 = vand.u32 4294901760, %v3142_v51 }
  0x98   :  { %2276 = vmatmul.mubr.f32.vlgmr.msra.gmra.mrb[4].mxu1 %v2996_v35  ;;  %2287 = vmatmul.mubr.f32.vlgmr.msra.gmra.mrb[6].mxu0 %v726_v43  ;;  %v2444_v35 = vpack.c.bf16 %v756_v37, %v749_v15  ;;  %v1221_v37 = vand.u32 4294901760, %v1161_v33  ;;  %v1163_v43 = vld [vmem:[#allocation10 + $0x80] sm:$0xff]  ;;  %v3246_v40 = vsub.f32 %v3142_v51, %v1195_v53 }
  0x99   :  { %2424 = vmatpush3.bf16.msra.mxu1 %v2423_v44  ;;  %2430 = vmatpush3.bf16.msra.mxu0 %v2429_v45  ;;  %v1165_v44 = vld [vmem:[#allocation10 + $0x90] sm:$0xff] }
  0x9a   :  { %2425 = vmatprep.subr.bf16.mxu1 %v2843_v0  ;;  %2431 = vmatprep.subr.bf16.mxu0 %v2843_v0 }
  0x9b   :  { %2297 = vmatprep.mubr.msk.f32.mxu1 %vm2844_vm0, %v3588_v1  ;;  %2308 = vmatprep.mubr.msk.f32.mxu0 %vm2844_vm0, %v3588_v1 }
  0x9d   :  { %2427 = vmatpush3.bf16.msra.mxu1 %v2426_v47  ;;  %2433 = vmatpush3.bf16.msra.mxu0 %v2432_v48  ;;  %v3205_v47 = vsub.f32 %v1161_v33, %v1221_v37  ;;  %v3209_v48 = vpack.c.bf16 %v1227_v21, %v1223_v42  ;;  %v1175_v21 = vld [vmem:[#allocation10 + $0xe0] sm:$0xff] }
  0x9e   :  { %2434 = vmatprep.subr.bf16.mxu1 %v2843_v0  ;;  %2440 = vmatprep.subr.bf16.mxu0 %v2843_v0 }
  0x9f   :  { %3620 = vst [vmem:[#allocation27_spill] sm:$0xff] %v3209_v48 }
  0xa0   :  { %2298 = vmatmul.mubr.f32.vlgmr.msra.gmra.mrb[6].mxu1 %v3082_v19  ;;  %2309 = vmatmul.mubr.f32.vlgmr.msra.gmra.mrb[8].mxu0 %v3094_v24  ;;  %v1160_v24 = vld [vmem:[#allocation10 + $0x68] sm:$0xff] }
  0xa1   :  { %2436 = vmatpush3.bf16.msra.mxu1 %v2417_v31  ;;  %2442 = vmatpush3.bf16.msra.mxu0 %v2441_v49  ;;  %v1225_v49 = vand.u32 4294901760, %v1163_v43 }
  0xa2   :  { %2437 = vmatprep.subr.bf16.mxu1 %v2843_v0  ;;  %2443 = vmatprep.subr.bf16.mxu0 %v2843_v0 }
  0xa3   :  { %2319 = vmatprep.mubr.msk.f32.mxu1 %vm2844_vm0, %v3588_v1  ;;  %2330 = vmatprep.mubr.msk.f32.mxu0 %vm2844_vm0, %v3588_v1  ;;  %v3219_v61 = vsub.f32 %v1163_v43, %v1225_v49  ;;  %v1177_v43 = vld [vmem:[#allocation10 + $0xf0] sm:$0xff] }
  0xa5   :  { %2439 = vmatpush3.bf16.msra.mxu1 %v2420_v38  ;;  %2445 = vmatpush3.bf16.msra.mxu0 %v2444_v35  ;;  %v1229_v35 = vand.u32 4294901760, %v1165_v44 }
  0xa6   :  { %2446 = vmatprep.subr.bf16.mxu1 %v2843_v0 }
  0xa7   :  { %v3217_v60 = vpack.c.bf16 %v1229_v35, %v1225_v49  ;;  %v3221_v63 = vsub.f32 %v1165_v44, %v1229_v35  ;;  %v1249_v44 = vand.u32 4294901760, %v1175_v21  ;;  %v1253_v49 = vand.u32 4294901760, %v1177_v43 }
  0xa8   :  { %2320 = vmatmul.mubr.f32.vlgmr.msra.gmra.mrb[8].mxu1 %v724_v32  ;;  %2331 = vmatmul.mubr.f32.vlgmr.msra.gmra.mrb[10].mxu0 %v3082_v19  ;;  %v1159_v32 = vld [vmem:[#allocation10 + $0x60] sm:$0xff] }
  0xa9   :  { %2448 = vmatpush3.bf16.msra.mxu1 %v2417_v31  ;;  %2341 = vmatprep.mubr.msk.f32.mxu1 %vm2844_vm0, %v3588_v1  ;;  %v1215_v31 = vand.u32 4294901760, %v1160_v24  ;;  %v1217_v15 = vand.u32 4294901760, %v1159_v32  ;;  %3621 = vst [vmem:[#allocation28_spill] sm:$0xff] %v3217_v60 }
  0xaa   :  { %2449 = vmatprep.subr.bf16.mxu1 %v2843_v0  ;;  %1764 = vmatprep.mubr.f32.mxu0 %v3588_v1  ;;  %v3150_v0 = vpack.c.bf16 %v1195_v53, %v1191_v52  ;;  %v3260_v53 = vsub.f32 %v1168_v56, %v1231_v2  ;;  %v3283_v2 = vsub.f32 %v1177_v43, %v1253_v49 }
  0xab   :  { %v3196_v39 = vpack.c.bf16 %v1221_v37, %v1217_v15  ;;  %v3198_v45 = vsub.f32 %v1160_v24, %v1215_v31  ;;  %v3203_v36 = vsub.f32 %v1159_v32, %v1217_v15  ;;  %v1173_v24 = vld [vmem:[#allocation10 + $0xd0] sm:$0xff]  ;;  %v3233_v32 = vpack.c.bf16 %v1243_v22, %v1239_v14  ;;  %v1178_v15 = vld [vmem:[#allocation10 + $0xf8] sm:$0xff] }
  0xac   :  { %3612 = vst [vmem:[#allocation19_spill] sm:$0xff] %v3150_v0  ;;  %2549 = vmatprep.subr.bf16.mxu0 %v3150_v0  ;;  %v3241_v37 = vsub.f32 %v3140_v50, %v1191_v52  ;;  %v1251_v42 = vand.u32 4294901760, %v1178_v15  ;;  %v3254_v50 = vpack.c.bf16 %v1253_v49, %v1249_v44  ;;  %v1313_v52 = vand.u32 4294901760, %v3246_v40 }
  0xad   :  { %2451 = vmatpush3.bf16.msra.mxu1 %v2420_v38  ;;  %2551 = vmatpush1.bf16.msra.mxu0 %v3152_v58  ;;  %v3194_v38 = vpack.c.bf16 %v1219_v34, %v1215_v31  ;;  %3619 = vst [vmem:[#allocation26_spill] sm:$0xff] %v3196_v39  ;;  %v1245_v31 = vand.u32 4294901760, %v1173_v24  ;;  %3624 = vst [vmem:[#allocation31_spill] sm:$0xff] %v3233_v32  ;;  %v1176_v34 = vld [vmem:[#allocation10 + $0xe8] sm:$0xff] }
  0xae   :  { %2453 = vmatprep.subr.bf16.mxu1 %v3150_v0  ;;  %2553 = vmatprep.subr.bf16.mxu0 %v3162_v7  ;;  %v1247_v41 = vand.u32 4294901760, %v1176_v34  ;;  %3627 = vst [vmem:[#allocation34_spill] sm:$0xff] %v3254_v50  ;;  %v1301_v51 = vand.u32 4294901760, %v3241_v37  ;;  %v3279_v56 = vsub.f32 %v1178_v15, %v1251_v42 }
  0xaf   :  { %3618 = vst [vmem:[#allocation25_spill] sm:$0xff] %v3194_v38  ;;  %v3236_v33 = vpack.c.bf16 %v1245_v31, %v1241_v27 }
  0xb0   :  { %2342 = vmatmul.mubr.f32.vlgmr.msra.gmra.mrb[10].mxu1 %v3082_v19  ;;  %v3174_v19 = vsub.f32 %v1153_v4, %v1205_v6  ;;  %v1169_v4 = vld [vmem:[#allocation10 + $0xb0] sm:$0xff]  ;;  %v1233_v6 = vand.u32 4294901760, %v1167_v3  ;;  %v3251_v35 = vpack.c.bf16 %v1251_v42, %v1247_v41  ;;  %3632 = vst [vmem:[#allocation39_spill] sm:$0xff] %v3279_v56 }
  0xb1   :  { %1287 = vmatprep.mubr.f32.mxu1 %v3588_v1  ;;  %2455 = vmatpush1.bf16.msra.mxu1 %v3152_v58  ;;  %v1237_v9 = vand.u32 4294901760, %v1169_v4  ;;  %3625 = vst [vmem:[#allocation32_spill] sm:$0xff] %v3236_v33  ;;  %v3262_v1 = vsub.f32 %v1170_v57, %v1235_v5  ;;  %v3281_v57 = vsub.f32 %v1175_v21, %v1249_v44  ;;  %v1319_v5 = vand.u32 4294901760, %v3157_v62 }
  0xb2   :  { %2457 = vmatprep.subr.bf16.mxu1 %v3162_v7  ;;  %2555 = vmatpush1.bf16.msra.mxu0 %v3164_v8  ;;  %3626 = vst [vmem:[#allocation33_spill] sm:$0xff] %v3251_v35  ;;  %v1343_v15 = vand.u32 4294901760, %v3174_v19 }
  0xb3   :  { %2557 = vmatprep.subr.bf16.mxu0 %v3177_v20  ;;  %v3228_v11 = vpack.c.bf16 %v1237_v9, %v1233_v6  ;;  %3633 = vst [vmem:[#allocation40_spill] sm:$0xff] %v3281_v57 }
  0xb5   :  { %2459 = vmatpush1.bf16.msra.mxu1 %v3164_v8  ;;  %3623 = vst [vmem:[#allocation30_spill] sm:$0xff] %v3228_v11 }
  0xb6   :  { %2461 = vmatprep.subr.bf16.mxu1 %v3177_v20  ;;  %2559 = vmatpush1.bf16.msra.mxu0 %v3185_v28 }
  0xb7   :  { %2561 = vmatprep.subr.bf16.mxu0 %v3194_v38 }
  0xb9   :  { %2463 = vmatpush1.bf16.msra.mxu1 %v3185_v28 }
  0xba   :  { %2563 = vmatpush1.bf16.msra.mxu0 %v3196_v39  ;;  %2465 = vmatprep.subr.bf16.mxu1 %v3194_v38 }
  0xbb   :  { %2565 = vmatprep.subr.bf16.mxu0 %v3209_v48 }
  0xbd   :  { %2467 = vmatpush1.bf16.msra.mxu1 %v3196_v39 }
  0xbe   :  { %2469 = vmatprep.subr.bf16.mxu1 %v3209_v48  ;;  %2567 = vmatpush1.bf16.msra.mxu0 %v3217_v60  ;;  %v3274_v48 = vsub.f32 %v1173_v24, %v1245_v31  ;;  %v1320_v24 = vsub.f32 %v3157_v62, %v1319_v5 }
  0xbf   :  { %2569 = vmatprep.subr.bf16.mxu0 %v3225_v10 }
  0xc0   :  { %3630 = vst [vmem:[#allocation37_spill] sm:$0xff] %v3274_v48  ;;  %v1321_v42 = vand.u32 4294901760, %v1320_v24 }
  0xc1   :  { %2471 = vmatpush1.bf16.msra.mxu1 %v3217_v60  ;;  %v3272_v60 = vsub.f32 %v1171_v25, %v1241_v27 }
  0xc2   :  { %2473 = vmatprep.subr.bf16.mxu1 %v3225_v10  ;;  %2571 = vmatpush1.bf16.msra.mxu0 %v3228_v11  ;;  %v3268_v10 = vsub.f32 %v1172_v12, %v1239_v14  ;;  %v1325_v12 = vand.u32 4294901760, %v3168_v16 }
  0xc3   :  { %2573 = vmatprep.subr.bf16.mxu0 %v3233_v32  ;;  %3629 = vst [vmem:[#allocation36_spill] sm:$0xff] %v3272_v60 }
  0xc4   :  { %3628 = vst [vmem:[#allocation35_spill] sm:$0xff] %v3268_v10  ;;  %v1326_v21 = vsub.f32 %v3168_v16, %v1325_v12 }
  0xc5   :  { %2475 = vmatpush1.bf16.msra.mxu1 %v3228_v11  ;;  %v3266_v11 = vsub.f32 %v1169_v4, %v1237_v9  ;;  %v1307_v4 = vand.u32 4294901760, %v3154_v59  ;;  %v1314_v9 = vsub.f32 %v3246_v40, %v1313_v52 }
  0xc6   :  { %2477 = vmatprep.subr.bf16.mxu1 %v3233_v32  ;;  %2575 = vmatpush1.bf16.msra.mxu0 %v3236_v33  ;;  %v3264_v32 = vsub.f32 %v1167_v3, %v1233_v6  ;;  %v2580_v3 = vpack.c.bf16 %v1313_v52, %v1301_v51  ;;  %v1302_v6 = vsub.f32 %v3241_v37, %v1301_v51  ;;  %v1349_v51 = vand.u32 4294901760, %v3180_v26 }
  0xc7   :  { %2577 = vmatprep.subr.bf16.mxu0 %v3251_v35  ;;  %v3292_v14 = vpack.c.bf16 %v1319_v5, %v1307_v4  ;;  %v1308_v25 = vsub.f32 %v3154_v59, %v1307_v4  ;;  %v1315_v27 = vand.u32 4294901760, %v1314_v9  ;;  %v1361_v52 = vand.u32 4294901760, %v3182_v23 }
  0xc8   :  { %v1327_v4 = vand.u32 4294901760, %v1326_v21 }
  0xc9   :  { %2479 = vmatpush1.bf16.msra.mxu1 %v3236_v33  ;;  %v3270_v33 = vsub.f32 %v1174_v13, %v1243_v22  ;;  %v1337_v13 = vand.u32 4294901760, %v3170_v17  ;;  %v1303_v22 = vand.u32 4294901760, %v1302_v6  ;;  %v3309_v9 = vpack.c.bf16 %v1361_v52, %v1349_v51 }
  0xca   :  { %2481 = vmatprep.subr.bf16.mxu1 %v3251_v35  ;;  %2579 = vmatpush1.bf16.msra.mxu0 %v3254_v50  ;;  %v3277_v35 = vsub.f32 %v1176_v34, %v1247_v41  ;;  %v1331_v34 = vand.u32 4294901760, %v3172_v18  ;;  %v1309_v41 = vand.u32 4294901760, %v1308_v25 }
  0xcb   :  { %2581 = vmatprep.subr.bf16.mxu0 %v2580_v3  ;;  %v3296_v31 = vpack.c.bf16 %v1337_v13, %v1325_v12  ;;  %v1338_v43 = vsub.f32 %v3170_v17, %v1337_v13  ;;  %v2484_v44 = vpack.c.bf16 %v1315_v27, %v1303_v22  ;;  %v1344_v12 = vsub.f32 %v3174_v19, %v1343_v15 }
  0xcc   :  { %3631 = vst [vmem:[#allocation38_spill] sm:$0xff] %v3277_v35  ;;  %v3302_v49 = vpack.c.bf16 %v1343_v15, %v1331_v34  ;;  %v3306_v3 = vpack.c.bf16 %v1321_v42, %v1309_v41  ;;  %v1332_v6 = vsub.f32 %v3172_v18, %v1331_v34  ;;  %v1355_v13 = vand.u32 4294901760, %v3187_v29 }
  0xcd   :  { %2483 = vmatpush1.bf16.msra.mxu1 %v3254_v50  ;;  %v1339_v5 = vand.u32 4294901760, %v1338_v43  ;;  %v1367_v22 = vand.u32 4294901760, %v3189_v30  ;;  %v1350_v27 = vsub.f32 %v3180_v26, %v1349_v51  ;;  %v1362_v41 = vsub.f32 %v3182_v23, %v1361_v52 }
  0xce   :  { %2485 = vmatprep.subr.bf16.mxu1 %v2484_v44  ;;  %v1333_v24 = vand.u32 4294901760, %v1332_v6  ;;  %v1345_v42 = vand.u32 4294901760, %v1344_v12  ;;  %v1373_v34 = vand.u32 4294901760, %v3198_v45  ;;  %v1385_v43 = vand.u32 4294901760, %v3200_v46 }
  0xcf   :  { %v3314_v25 = vpack.c.bf16 %v1339_v5, %v1327_v4  ;;  %v3318_v21 = vpack.c.bf16 %v1367_v22, %v1355_v13  ;;  %v1351_v44 = vand.u32 4294901760, %v1350_v27  ;;  %v1363_v15 = vand.u32 4294901760, %v1362_v41 }
  0xd0   :  { %v1356_v50 = vsub.f32 %v3187_v29, %v1355_v13  ;;  %v1368_v39 = vsub.f32 %v3189_v30, %v1367_v22  ;;  %v3324_v4 = vpack.c.bf16 %v1345_v42, %v1333_v24  ;;  %v3326_v5 = vpack.c.bf16 %v1385_v43, %v1373_v34 }
  0xd1   :  { %v1379_v51 = vand.u32 4294901760, %v3203_v36  ;;  %v1391_v52 = vand.u32 4294901760, %v3205_v47  ;;  %v3330_v6 = vpack.c.bf16 %v1363_v15, %v1351_v44  ;;  %v1374_v28 = vsub.f32 %v3198_v45, %v1373_v34 }
  0xd2   :  { %v1357_v12 = vand.u32 4294901760, %v1356_v50  ;;  %v1369_v38 = vand.u32 4294901760, %v1368_v39  ;;  %v1386_v13 = vsub.f32 %v3200_v46, %v1385_v43  ;;  %v1397_v22 = vand.u32 4294901760, %v3211_v54 }
  0xd3   :  { %v3333_v27 = vpack.c.bf16 %v1391_v52, %v1379_v51  ;;  %v1409_v24 = vand.u32 4294901760, %v3213_v55  ;;  %v1375_v42 = vand.u32 4294901760, %v1374_v28  ;;  %v1380_v20 = vsub.f32 %v3203_v36, %v1379_v51 }
  0xd4   :  { %v3338_v41 = vpack.c.bf16 %v1369_v38, %v1357_v12  ;;  %v1392_v44 = vsub.f32 %v3205_v47, %v1391_v52  ;;  %v1387_v15 = vand.u32 4294901760, %v1386_v13  ;;  %v1403_v39 = vand.u32 4294901760, %v3219_v61 }
  0xd5   :  { %3634 = vst [vmem:[#allocation41_spill] sm:$0xff] %v3333_v27  ;;  %v3342_v50 = vpack.c.bf16 %v1409_v24, %v1397_v22  ;;  %v1415_v34 = vand.u32 4294901760, %v3221_v63  ;;  %v1381_v8 = vand.u32 4294901760, %v1380_v20  ;;  %v1398_v7 = vsub.f32 %v3211_v54, %v1397_v22 }
  0xd6   :  { %v1393_v43 = vand.u32 4294901760, %v1392_v44  ;;  %v1410_v58 = vsub.f32 %v3213_v55, %v1409_v24  ;;  %v3348_v38 = vpack.c.bf16 %v1387_v15, %v1375_v42  ;;  %v1421_v51 = vand.u32 4294901760, %v3260_v53 }
  0xd7   :  { %3635 = vst [vmem:[#allocation42_spill] sm:$0xff] %v3342_v50  ;;  %v3350_v28 = vpack.c.bf16 %v1415_v34, %v1403_v39  ;;  %v1433_v52 = vand.u32 4294901760, %v3262_v1  ;;  %v1399_v13 = vand.u32 4294901760, %v1398_v7  ;;  %v1404_v50 = vsub.f32 %v3219_v61, %v1403_v39 }
  0xd8   :  { %3636 = vst [vmem:[#allocation43_spill] sm:$0xff] %v3348_v38  ;;  %v3354_v12 = vpack.c.bf16 %v1393_v43, %v1381_v8  ;;  %v1411_v0 = vand.u32 4294901760, %v1410_v58  ;;  %v1416_v22 = vsub.f32 %v3221_v63, %v1415_v34  ;;  %v1427_v24 = vand.u32 4294901760, %v3264_v32 }
  0xd9   :  { %3637 = vst [vmem:[#allocation44_spill] sm:$0xff] %v3350_v28  ;;  %v3357_v20 = vpack.c.bf16 %v1433_v52, %v1421_v51  ;;  %v1439_v42 = vand.u32 4294901760, %v3266_v11  ;;  %v1405_v15 = vand.u32 4294901760, %v1404_v50  ;;  %v1422_v28 = vsub.f32 %v3260_v53, %v1421_v51 }
  0xda   :  { %3638 = vst [vmem:[#allocation45_spill] sm:$0xff] %v3354_v12  ;;  %v3362_v44 = vpack.c.bf16 %v1411_v0, %v1399_v13  ;;  %v1434_v8 = vsub.f32 %v3262_v1, %v1433_v52  ;;  %v1417_v43 = vand.u32 4294901760, %v1416_v22  ;;  %v1445_v58 = vand.u32 4294901760, %v3268_v10 }
  0xdb   :  { %3639 = vst [vmem:[#allocation46_spill] sm:$0xff] %v3357_v20  ;;  %v3366_v7 = vpack.c.bf16 %v1439_v42, %v1427_v24  ;;  %v1457_v39 = vand.u32 4294901760, %v3270_v33  ;;  %v1423_v20 = vand.u32 4294901760, %v1422_v28  ;;  %v1428_v12 = vsub.f32 %v3264_v32, %v1427_v24 }
  0xdc   :  { %3640 = vst [vmem:[#allocation47_spill] sm:$0xff] %v3362_v44  ;;  %v1435_v34 = vand.u32 4294901760, %v1434_v8  ;;  %v1440_v38 = vsub.f32 %v3266_v11, %v1439_v42  ;;  %v3372_v0 = vpack.c.bf16 %v1417_v43, %v1405_v15  ;;  %v1451_v51 = vand.u32 4294901760, %v3272_v60 }
  0xdd   :  { %3641 = vst [vmem:[#allocation48_spill] sm:$0xff] %v3366_v7  ;;  %v3374_v50 = vpack.c.bf16 %v1457_v39, %v1445_v58  ;;  %v1463_v52 = vand.u32 4294901760, %v3274_v48  ;;  %v1429_v22 = vand.u32 4294901760, %v1428_v12  ;;  %v1446_v44 = vsub.f32 %v3268_v10, %v1445_v58 }
  0xde   :  { %3642 = vst [vmem:[#allocation49_spill] sm:$0xff] %v3372_v0  ;;  %v3378_v13 = vpack.c.bf16 %v1435_v34, %v1423_v20  ;;  %v1441_v7 = vand.u32 4294901760, %v1440_v38  ;;  %v1458_v24 = vsub.f32 %v3270_v33, %v1457_v39  ;;  %v1469_v42 = vand.u32 4294901760, %v3277_v35 }
  0xdf   :  { %3643 = vst [vmem:[#allocation50_spill] sm:$0xff] %v3374_v50  ;;  %v3381_v28 = vpack.c.bf16 %v1463_v52, %v1451_v51  ;;  %v1481_v15 = vand.u32 4294901760, %v3279_v56  ;;  %v1447_v43 = vand.u32 4294901760, %v1446_v44  ;;  %v1452_v50 = vsub.f32 %v3272_v60, %v1451_v51 }
  0xe0   :  { %3644 = vst [vmem:[#allocation51_spill] sm:$0xff] %v3378_v13  ;;  %v3386_v8 = vpack.c.bf16 %v1441_v7, %v1429_v22  ;;  %v1464_v20 = vsub.f32 %v3274_v48, %v1463_v52  ;;  %v1459_v34 = vand.u32 4294901760, %v1458_v24  ;;  %v1475_v38 = vand.u32 4294901760, %v3281_v57 }
  0xe1   :  { %3645 = vst [vmem:[#allocation52_spill] sm:$0xff] %v3381_v28  ;;  %v3390_v12 = vpack.c.bf16 %v1481_v15, %v1469_v42  ;;  %v1487_v58 = vand.u32 4294901760, %v3283_v2  ;;  %v1453_v28 = vand.u32 4294901760, %v1452_v50  ;;  %v1470_v13 = vsub.f32 %v3277_v35, %v1469_v42 }
  0xe2   :  { %3646 = vst [vmem:[#allocation53_spill] sm:$0xff] %v3386_v8  ;;  %v1465_v39 = vand.u32 4294901760, %v1464_v20  ;;  %v1482_v0 = vsub.f32 %v3279_v56, %v1481_v15  ;;  %v3396_v7 = vpack.c.bf16 %v1459_v34, %v1447_v43  ;;  %v1476_v51 = vsub.f32 %v3281_v57, %v1475_v38 }
  0xe3   :  { %3647 = vst [vmem:[#allocation54_spill] sm:$0xff] %v3390_v12  ;;  %v3398_v44 = vpack.c.bf16 %v1487_v58, %v1475_v38  ;;  %v1488_v52 = vsub.f32 %v3283_v2, %v1487_v58  ;;  %v1471_v24 = vand.u32 4294901760, %v1470_v13 }
  0xe4   :  { %v3402_v22 = vpack.c.bf16 %v1465_v39, %v1453_v28  ;;  %v1483_v12 = vand.u32 4294901760, %v1482_v0  ;;  %v1477_v8 = vand.u32 4294901760, %v1476_v51 }
  0xe5   :  { %v1489_v27 = vand.u32 4294901760, %v1488_v52 }
  0xe6   :  { %v3404_v50 = vpack.c.bf16 %v1483_v12, %v1471_v24 }
  0xe7   :  { %v3406_v20 = vpack.c.bf16 %v1489_v27, %v1477_v8 }
 0x143   :  { %v191_v38 = vpop.f32.mrb[0].mxu0 }
 0x144   :  { %v2182_v58 = vpop.f32.mrb[1].mxu0 }
 0x14b   :  { %v302_v8 = vpop.f32.mrb[0].mxu1 }
 0x14c   :  { %v303_v27 = vadd.f32 %v302_v8, %v191_v38  ;;  %v2201_v34 = vpop.f32.mrb[1].mxu1 }
 0x153   :  { %v390_v13 = vpop.f32.mrb[2].mxu0 }
 0x154   :  { %v391_v39 = vadd.f32 %v390_v13, %v303_v27  ;;  %v2220_v0 = vpop.f32.mrb[3].mxu0 }
 0x15b   :  { %v471_v28 = vpop.f32.mrb[2].mxu1 }
 0x15c   :  { %v472_v51 = vadd.f32 %v471_v28, %v391_v39  ;;  %v2239_v43 = vpop.f32.mrb[3].mxu1 }
 0x163   :  { %v566_v15 = vpop.f32.mrb[4].mxu0 }
 0x164   :  { %v567_v52 = vadd.f32 %v566_v15, %v472_v51  ;;  %v2258_v42 = vpop.f32.mrb[5].mxu0 }
 0x16b   :  { %v645_v10 = vpop.f32.mrb[4].mxu1  ;;  %v728_v24 = vpop.f32.mrb[6].mxu0 }
 0x16c   :  { %v646_v60 = vadd.f32 %v645_v10, %v567_v52  ;;  %v2277_v8 = vpop.f32.mrb[5].mxu1  ;;  %v2288_v34 = vpop.f32.mrb[7].mxu0  ;;  %v2079_v10 = vld [vmem:[%s3583_s4] ss:$0 sm:$0xff] }
 0x16d   :  { %v3661_v8 = vld [vmem:[#allocation52_spill] sm:$0xff]  ;;  %v3662_v34 = vld [vmem:[#allocation54_spill] sm:$0xff] }
 0x16e   :  { %v729_v38 = vadd.f32 %v728_v24, %v646_v60 }
 0x173   :  { %v819_v48 = vpop.f32.mrb[6].mxu1  ;;  %v899_v12 = vpop.f32.mrb[8].mxu0 }
 0x174   :  { %v820_v35 = vadd.f32 %v819_v48, %v729_v38  ;;  %v2299_v56 = vpop.f32.mrb[7].mxu1  ;;  %v2310_v58 = vpop.f32.mrb[9].mxu0  ;;  %v3663_v38 = vld [vmem:[#allocation19_spill] sm:$0xff] }
 0x175   :  { %v3660_v58 = vld [vmem:[#allocation53_spill] sm:$0xff] }
 0x176   :  { %v900_v57 = vadd.f32 %v899_v12, %v820_v35 }
 0x17b   :  { %v976_v13 = vpop.f32.mrb[8].mxu1  ;;  %v1059_v0 = vpop.f32.mrb[10].mxu0 }
 0x17c   :  { %v977_v27 = vadd.f32 %v976_v13, %v900_v57  ;;  %v2321_v28 = vpop.f32.mrb[9].mxu1  ;;  %v2332_v43 = vpop.f32.mrb[11].mxu0  ;;  %v3648_v57 = vmov 0.0   ;;  %v3664_v13 = vld [vmem:[#allocation20_spill] sm:$0xff] }
 0x17d   :  { %v3693_v43 = vld [vmem:[#allocation36_spill] sm:$0xff] }
 0x17e   :  { %v1060_v39 = vadd.f32 %v1059_v0, %v977_v27  ;;  %v3665_v0 = vpack.c.bf16 %v3246_v40, %v3241_v37  ;;  %v3671_v37 = vpack.c.bf16 %v3174_v19, %v3172_v18  ;;  %v3672_v40 = vld [vmem:[#allocation24_spill] sm:$0xff]  ;;  %v3677_v27 = vpack.c.bf16 %v3200_v46, %v3198_v45  ;;  %v3678_v18 = vld [vmem:[#allocation27_spill] sm:$0xff]  ;;  %v3684_v45 = vld [vmem:[#allocation30_spill] sm:$0xff] }
 0x17f   :  { %v3679_v19 = vpack.c.bf16 %v3205_v47, %v3203_v36  ;;  %v3685_v46 = vpack.c.bf16 %v3262_v1, %v3260_v53  ;;  %v3686_v36 = vld [vmem:[#allocation31_spill] sm:$0xff]  ;;  %v3687_v47 = vpack.c.bf16 %v3266_v11, %v3264_v32  ;;  %v3695_v1 = vld [vmem:[#allocation34_spill] sm:$0xff]  ;;  %v3699_v11 = vld [vmem:[#allocation40_spill] sm:$0xff] }
 0x180   :  { %v3696_v53 = vld [vmem:[#allocation39_spill] sm:$0xff]  ;;  %v3700_v32 = vpack.c.bf16 %v3283_v2, %v3699_v11 }
 0x183   :  { %v1134_v15 = vpop.f32.mrb[10].mxu1 }
 0x184   :  { %v1135_v42 = vadd.f32 %v1134_v15, %v1060_v39  ;;  %v2343_v51 = vpop.f32.mrb[11].mxu1  ;;  %v3697_v15 = vld [vmem:[#allocation38_spill] sm:$0xff] }
 0x186   :  { %v1145_v60 = vadd.f32 %v2079_v10, %v1135_v42  ;;  %v3698_v10 = vpack.c.bf16 %v3696_v53, %v3697_v15 }
 0x188   :  { %v1146_v52 = vmax.f32 %v1145_v60, 0.0  ;;  %v1179_v60 = vld [vmem:[%s3585_s6] sm:$0x3]  ;;  %s2780_s6 = scalar_lea.vmem %s2055_s23, 128 }
 0x189   :  { %p2781_p12 = scmp.ne.s32.totalorder %s2055_s23, %s2780_s6  ;;  %p2786_p0 = scmp.lt.s32.totalorder %s2780_s6, %s2780_s6 }
 0x18a   :  { %v3443_v24 = vand.u32 4294901760, %v1146_v52 }
 0x18b   :  { %p2787_p1 = por %p2786_p0, %p2785_p13 }
 0x18c   :  { %v3446_v48 = vsub.f32 %v1146_v52, %v3443_v24 }
 0x18d   :  { %p2788_p2 = pnand %p2787_p1, %p2781_p12 }
 0x18e   :  { %v1290_v35 = vand.u32 4294901760, %v3446_v48 }
 0x190   :  { %1768 = vmatmul.mubr.f32.vlgmr.msra.gmra.mrb[12].mxu0 %v1290_v35  ;;  %v1291_v56 = vsub.f32 %v3446_v48, %v1290_v35 }
 0x191   :  { %2583 = vmatpush1.bf16.msra.mxu0 %v3292_v14  ;;  %1934 = vmatprep.mubr.f32.mxu0 %v3648_v57  ;;  %v3649_v14 = vld [vmem:[#allocation41_spill] sm:$0xff] }
 0x192   :  { %2585 = vmatprep.subr.bf16.mxu0 %v3296_v31  ;;  %v1292_v12 = vand.u32 4294901760, %v1291_v56  ;;  %v3650_v31 = vld [vmem:[#allocation43_spill] sm:$0xff] }
 0x194   :  { %1293 = vmatmul.mubr.f32.vlgmr.msra.gmra.mrb[12].mxu1 %v1292_v12 }
 0x195   :  { %2487 = vmatpush1.bf16.msra.mxu1 %v3306_v3  ;;  %2587 = vmatpush1.bf16.msra.mxu0 %v3302_v49  ;;  %v3651_v49 = vld [vmem:[#allocation42_spill] sm:$0xff]  ;;  %v3652_v3 = vld [vmem:[#allocation45_spill] sm:$0xff] }
 0x196   :  { %2489 = vmatprep.subr.bf16.mxu1 %v3314_v25  ;;  %2589 = vmatprep.subr.bf16.mxu0 %v3309_v9  ;;  %v3653_v9 = vld [vmem:[#allocation44_spill] sm:$0xff]  ;;  %v3654_v25 = vld [vmem:[#allocation47_spill] sm:$0xff] }
 0x197   :  { %1523 = vmatprep.mubr.f32.mxu1 %v3648_v57 }
 0x199   :  { %2491 = vmatpush1.bf16.msra.mxu1 %v3324_v4  ;;  %2591 = vmatpush1.bf16.msra.mxu0 %v3318_v21  ;;  %v3655_v4 = vld [vmem:[#allocation46_spill] sm:$0xff]  ;;  %v3656_v21 = vld [vmem:[#allocation49_spill] sm:$0xff] }
 0x19a   :  { %2493 = vmatprep.subr.bf16.mxu1 %v3330_v6  ;;  %2593 = vmatprep.subr.bf16.mxu0 %v3326_v5  ;;  %v3657_v6 = vld [vmem:[#allocation48_spill] sm:$0xff]  ;;  %v3658_v5 = vld [vmem:[#allocation51_spill] sm:$0xff] }
 0x19d   :  { %2495 = vmatpush1.bf16.msra.mxu1 %v3338_v41  ;;  %2595 = vmatpush1.bf16.msra.mxu0 %v3649_v14  ;;  %v3659_v41 = vld [vmem:[#allocation50_spill] sm:$0xff] }
 0x19e   :  { %2497 = vmatprep.subr.bf16.mxu1 %v3650_v31  ;;  %2597 = vmatprep.subr.bf16.mxu0 %v3651_v49 }
 0x1a1   :  { %2499 = vmatpush1.bf16.msra.mxu1 %v3652_v3  ;;  %2599 = vmatpush1.bf16.msra.mxu0 %v3653_v9 }
 0x1a2   :  { %2501 = vmatprep.subr.bf16.mxu1 %v3654_v25  ;;  %2601 = vmatprep.subr.bf16.mxu0 %v3655_v4 }
 0x1a5   :  { %2503 = vmatpush1.bf16.msra.mxu1 %v3656_v21  ;;  %2603 = vmatpush1.bf16.msra.mxu0 %v3657_v6 }
 0x1a6   :  { %2505 = vmatprep.subr.bf16.mxu1 %v3658_v5  ;;  %2605 = vmatprep.subr.bf16.mxu0 %v3659_v41 }
 0x1a9   :  { %2507 = vmatpush1.bf16.msra.mxu1 %v3660_v58  ;;  %2607 = vmatpush1.bf16.msra.mxu0 %v3661_v8 }
 0x1aa   :  { %2509 = vmatprep.subr.bf16.mxu1 %v3396_v7  ;;  %2609 = vmatprep.subr.bf16.mxu0 %v3662_v34  ;;  %v3666_v7 = vld [vmem:[#allocation21_spill] sm:$0xff] }
 0x1ad   :  { %2511 = vmatpush1.bf16.msra.mxu1 %v3402_v22  ;;  %2611 = vmatpush1.bf16.msra.mxu0 %v3398_v44  ;;  %v3667_v44 = vpack.c.bf16 %v3157_v62, %v3154_v59  ;;  %v3668_v22 = vld [vmem:[#allocation22_spill] sm:$0xff]  ;;  %v3673_v59 = vpack.c.bf16 %v3182_v23, %v3180_v26  ;;  %v3674_v62 = vld [vmem:[#allocation25_spill] sm:$0xff]  ;;  %v3680_v26 = vld [vmem:[#allocation28_spill] sm:$0xff]  ;;  %v3681_v23 = vpack.c.bf16 %v3213_v55, %v3211_v54 }
 0x1ae   :  { %2513 = vmatprep.subr.bf16.mxu1 %v3404_v50  ;;  %2613 = vmatprep.subr.bf16.mxu0 %v3663_v38  ;;  %v3669_v50 = vpack.c.bf16 %v3170_v17, %v3168_v16  ;;  %v3675_v16 = vpack.c.bf16 %v3189_v30, %v3187_v29  ;;  %v3676_v17 = vld [vmem:[#allocation26_spill] sm:$0xff]  ;;  %v3682_v29 = vld [vmem:[#allocation29_spill] sm:$0xff]  ;;  %v3683_v30 = vpack.c.bf16 %v3221_v63, %v3219_v61  ;;  %v3688_v54 = vld [vmem:[#allocation32_spill] sm:$0xff] }
 0x1af   :  { %v3689_v55 = vld [vmem:[#allocation35_spill] sm:$0xff]  ;;  %v3691_v61 = vld [vmem:[#allocation33_spill] sm:$0xff] }
 0x1b0   :  { %1936 = vmatmul.mubr.f32.vlgmr.msra.gmra.mrb[12].mxu0 %v3443_v24  ;;  %v3690_v28 = vpack.c.bf16 %v3270_v33, %v3689_v55  ;;  %v3692_v63 = vld [vmem:[#allocation37_spill] sm:$0xff]  ;;  %v1181_v33 = vlaneseq }
 0x1b1   :  { %2515 = vmatpush1.bf16.msra.mxu1 %v3406_v20  ;;  %2615 = vmatpush1.bf16.msra.mxu0 %v3664_v13  ;;  %v3670_v20 = vld [vmem:[#allocation23_spill] sm:$0xff]  ;;  %v3694_v39 = vpack.c.bf16 %v3692_v63, %v3693_v43 }
 0x1b2   :  { %2517 = vmatprep.subr.bf16.mxu1 %v3665_v0  ;;  %2617 = vmatprep.subr.bf16.mxu0 %v3666_v7  ;;  %v1182_v42 = vshrl.u32 %v1181_v33, 7 }
 0x1b3   :  { %2038 = vmatprep.mubr.f32.mxu0 %v3648_v57 }
 0x1b4   :  { %1525 = vmatmul.mubr.f32.vlgmr.msra.gmra.mrb[12].mxu1 %v3443_v24  ;;  %v1183_v51 = vsub.s32 0, %v1182_v42  ;;  %v1187_v52 = vsub.s32 1, %v1182_v42 }
 0x1b5   :  { %2519 = vmatpush1.bf16.msra.mxu1 %v3667_v44  ;;  %2619 = vmatpush1.bf16.msra.mxu0 %v3668_v22 }
 0x1b6   :  { %2521 = vmatprep.subr.bf16.mxu1 %v3669_v50  ;;  %2621 = vmatprep.subr.bf16.mxu0 %v3670_v20  ;;  %v1188_v12 = vrot.slane %v1179_v60, %v1187_v52 }
 0x1b7   :  { %1659 = vmatprep.mubr.f32.mxu1 %v3648_v57  ;;  %v1184_v57 = vrot.slane %v1179_v60, %v1183_v51 }
 0x1b9   :  { %2523 = vmatpush1.bf16.msra.mxu1 %v3671_v37  ;;  %2623 = vmatpush1.bf16.msra.mxu0 %v3672_v40 }
 0x1ba   :  { %2525 = vmatprep.subr.bf16.mxu1 %v3673_v59  ;;  %2625 = vmatprep.subr.bf16.mxu0 %v3674_v62 }
 0x1bd   :  { %2527 = vmatpush1.bf16.msra.mxu1 %v3675_v16  ;;  %2627 = vmatpush1.bf16.msra.mxu0 %v3676_v17 }
 0x1be   :  { %2529 = vmatprep.subr.bf16.mxu1 %v3677_v27  ;;  %2629 = vmatprep.subr.bf16.mxu0 %v3678_v18 }
 0x1c1   :  { %2531 = vmatpush1.bf16.msra.mxu1 %v3679_v19  ;;  %2631 = vmatpush1.bf16.msra.mxu0 %v3680_v26 }
 0x1c2   :  { %2533 = vmatprep.subr.bf16.mxu1 %v3681_v23  ;;  %2633 = vmatprep.subr.bf16.mxu0 %v3682_v29 }
 0x1c5   :  { %2535 = vmatpush1.bf16.msra.mxu1 %v3683_v30  ;;  %2635 = vmatpush1.bf16.msra.mxu0 %v3684_v45 }
 0x1c6   :  { %2537 = vmatprep.subr.bf16.mxu1 %v3685_v46  ;;  %2637 = vmatprep.subr.bf16.mxu0 %v3686_v36 }
 0x1c9   :  { %2539 = vmatpush1.bf16.msra.mxu1 %v3687_v47  ;;  %2639 = vmatpush1.bf16.msra.mxu0 %v3688_v54 }
 0x1ca   :  { %2541 = vmatprep.subr.bf16.mxu1 %v3690_v28  ;;  %2641 = vmatprep.subr.bf16.mxu0 %v3691_v61 }
 0x1cd   :  { %2543 = vmatpush1.bf16.msra.mxu1 %v3694_v39  ;;  %2643 = vmatpush1.bf16.msra.mxu0 %v3695_v1 }
 0x1ce   :  { %2545 = vmatprep.subr.bf16.mxu1 %v3698_v10 }
 0x1d0   :  { %2040 = vmatmul.mubr.f32.vlgmr.msra.gmra.mrb[12].mxu0 %v3443_v24 }
 0x1d1   :  { %2547 = vmatpush1.bf16.msra.mxu1 %v3700_v32 }
 0x1d4   :  { %1662 = vmatmul.mubr.f32.vlgmr.msra.gmra.mrb[12].mxu1 %v3446_v48 }
 0x2a3   :  { %v2041_v35 = vpop.f32.mrb[12].mxu0 }
 0x2a4   :  { %v2043_v56 = vpop.f32.mrb[13].mxu0 }
 0x2a7   :  { %v1663_v14 = vpop.f32.mrb[12].mxu1 }
 0x2a8   :  { %v2644_v24 = vadd.f32 %v1663_v14, %v1184_v57  ;;  %v1665_v2 = vpop.f32.mrb[13].mxu1 }
 0x2a9   :  { %v2646_v48 = vadd.f32 %v1665_v2, %v1188_v12 }
 0x2aa   :  { %v2645_v31 = vadd.f32 %v2644_v24, %v2041_v35 }
 0x2ab   :  { %v2647_v49 = vadd.f32 %v2646_v48, %v2043_v56 }
 0x2ac   :  { %2046 = vst [vmem:[#allocation11] sm:$0xff] %v2645_v31 }
 0x2ad   :  { %2047 = vst [vmem:[#allocation12] sm:$0xff] %v2647_v49 }
 0x2ae   :  { %2791 = shalt.err (!%p2788_p2)
}
 0x2af   :  { %s2792_s1 = scalar_lea.hbm %s3586_s7, 128 }
 0x2b0   :  { %p2793_p3 = scmp.ne.s32.totalorder %s3586_s7, %s2792_s1  ;;  %p2796_p4 = scmp.lt.u32.totalorder %s2792_s1, %s3586_s7 }
 0x2b2   :  { %p2798_p5 = pnand %p2796_p4, %p2793_p3 }
 0x2b4   :  { %2801 = shalt.err (!%p2798_p5)
}
 0x2b5   :  { %2057 = dma.vmem_to_hbm [thread:$0]  %s2055_s23, 128, %s3586_s7, [#allocation4]  }
 0x2b6   :  { %s2802_s12 = scalar_lea.vmem %s2065_s25, 128  ;;  %p2807_p7 = scmp.lt.s32.totalorder %s2065_s25, %s2065_s25 }
 0x2b7   :  { %p2803_p6 = scmp.ne.s32.totalorder %s2065_s25, %s2802_s12  ;;  %p2808_p8 = scmp.lt.s32.totalorder %s2802_s12, %s2802_s12 }
 0x2b9   :  { %p2809_p9 = por %p2808_p8, %p2807_p7 }
 0x2bb   :  { %p2810_p10 = pnand %p2809_p9, %p2803_p6 }
 0x2bd   :  { %2813 = shalt.err (!%p2810_p10)
}
 0x2be   :  { %s2814_s15 = scalar_lea.hbm %s3587_s8, 128 }
 0x2bf   :  { %p2815_p11 = scmp.ne.s32.totalorder %s3587_s8, %s2814_s15  ;;  %p2818_p12 = scmp.lt.u32.totalorder %s2814_s15, %s3587_s8 }
 0x2c1   :  { %p2820_p13 = pnand %p2818_p12, %p2815_p11 }
 0x2c3   :  { %2823 = shalt.err (!%p2820_p13)
}
 0x2c4   :  { %2067 = dma.vmem_to_hbm [thread:$0]  %s2065_s25, 128, %s3587_s8, [#allocation13]  }
 0x2c5   :  { %2830 = dma.done.wait [#allocation4], 128  }
 0x2c6   :  { %2831 = vsyncadd [#allocation4], 4294967168 }
 0x2c7   :  { %2832 = dma.done.wait [#allocation13], 128  }
 0x2c8   :  { %2833 = vsyncadd [#allocation13], 4294967168 }
 0x2c9   :  { %2074 = vsyncpa [#allocation3], 1 }
 0x2ca   :  { %2075 = vsyncpa [#allocation6], 1 }
 0x2cb   :  { %2076 = vsyncpa [#allocation9], 1 }
 0x2cc   :  { %2077 = vsyncpa [#allocation4], 1 }
 0x2cd   :  { %2078 = vsyncpa [#allocation13], 1 }

</bundles_post_ra>
